<compile_context>
chip_gen: v5e
topology: v5e:2x2
jax: 0.10.0
libtpu: 0.0.40
codegen_flags: <defaults>
</compile_context>

<pallas_src>
import functools
import math

import jax
import jax.numpy as jnp
from jax.experimental import pallas as pl
from jax.experimental.pallas import tpu as pltpu

_LOG_EPS = math.log(1e-30)  # the reference clamps the mask at +1e-30 before log


def _log_sigmoid(z):
    # Numerically-stable log(sigmoid(z)) = min(z, 0) - log(1 + exp(-|z|)).
    # One exp + one log on the EUP (vs exp + recip + log previously).
    return jnp.minimum(z, 0.0) - jnp.log(1.0 + jnp.exp(-jnp.abs(z)))


def _finish_softmax(denom):
    r = pl.reciprocal(denom, approx=True)      # EUP vrcp
    return r * (2.0 - denom * r)               # one Newton step -> ~f32 exact


def _prefix_selector_kernel(x_ref, o_ref, *, tau, pre_seq_len, prefix_lanes):
    # x_ref/o_ref block: (TM, L) rows of attention scores.
    L = x_ref.shape[-1]

    def gate(xp):
        # log(sigmoid(xp*tau) + 1e-30) ~= max(log_sigmoid(xp*tau), log(1e-30))
        logmask = jnp.maximum(_log_sigmoid(xp * tau), _LOG_EPS)
        col = jax.lax.broadcasted_iota(jnp.int32, xp.shape, 1)
        return jnp.where(col < pre_seq_len, xp + logmask, xp)

    if prefix_lanes <= 0:
        # Degenerate pre_seq_len == 0: plain row softmax.
        y = x_ref[...].astype(jnp.float32)
        m = jnp.max(y, axis=-1, keepdims=True)
        e = jnp.exp(y - m)
        r = _finish_softmax(jnp.sum(e, axis=-1, keepdims=True))
        o_ref[...] = (e * r).astype(o_ref.dtype)
    elif prefix_lanes >= L:
        # Prefix slab covers the whole (narrow) row: compute in place.
        y = gate(x_ref[...].astype(jnp.float32))
        m = jnp.max(y, axis=-1, keepdims=True)
        e = jnp.exp(y - m)
        r = _finish_softmax(jnp.sum(e, axis=-1, keepdims=True))
        o_ref[...] = (e * r).astype(o_ref.dtype)
    else:
        # Piecewise path: gate only the 128-lane-aligned prefix slab, keep the
        # remainder untouched (log(1) == 0). No concatenate -- reductions run
        # per slab and two lane-aligned stores are issued (prefix_lanes is a
        # static multiple of 128), saving a full (TM, L) f32 VMEM copy.
        yp = gate(x_ref[:, :prefix_lanes].astype(jnp.float32))
        xr = x_ref[:, prefix_lanes:].astype(jnp.float32)
        m = jnp.maximum(jnp.max(yp, axis=-1, keepdims=True),
                        jnp.max(xr, axis=-1, keepdims=True))
        ep = jnp.exp(yp - m)
        er = jnp.exp(xr - m)
        denom = (jnp.sum(ep, axis=-1, keepdims=True)
                 + jnp.sum(er, axis=-1, keepdims=True))
        r = _finish_softmax(denom)
        o_ref[:, :prefix_lanes] = (ep * r).astype(o_ref.dtype)
        o_ref[:, prefix_lanes:] = (er * r).astype(o_ref.dtype)


def _vmem_capacity_bytes():
    # Conservative fallback = v7x (64 MiB per TensorCore).
    phys = 64 << 20
    try:
        info = pltpu.get_tpu_info()
        phys = int(getattr(info, "vmem_capacity_bytes", phys))
    except Exception:
        pass
    return phys


def _lane_pad(L):
    return ((L + 127) // 128) * 128


def _bytes_per_row(L, itemsize):
    # 2x double-buffered input + 2x output copies at I/O dtype, plus ~4 f32
    # in-kernel temporaries (upcast x, gated slab, exp, output staging).
    L_pad = _lane_pad(L)
    return 4 * L_pad * itemsize + 4 * L_pad * 4


def _pick_tm(M, L, itemsize, vmem_budget_bytes, target_tile_bytes=4 << 20):
    """Largest row tile within the VMEM budget, sized by bytes (not rows)."""
    pack = max(8, 32 // itemsize)              # sublane packing (f32=8, bf16=16)
    if M <= pack:
        return M                               # full dim is always legal
    L_pad = _lane_pad(L)
    tm_vmem = max(1, vmem_budget_bytes // _bytes_per_row(L, itemsize))
    tm_dma = max(1, target_tile_bytes // (L_pad * itemsize))  # ~4 MiB/input buf
    tm = min(M, tm_vmem, tm_dma)
    tm = max(pack, (tm // pack) * pack)
    # Guarantee >= 2 grid steps so both v7x TensorCores can be used via
    # dimension_semantics=("parallel",); costs one ~0.35us step on 1-TC chips.
    if pl.cdiv(M, tm) < 2:
        half = pl.cdiv(M, 2)
        if half >= pack:
            tm = max(pack, (half // pack) * pack)
    return min(tm, M)


def prefix_selector(attention_scores, *, tau, pre_seq_len, tm=None, donate=False):
    """Eval-mode PrefixSelector forward.

    attention_scores: (B, H, S, L) with L == pre_seq_len + S.
    bf16 input is supported (recommended at the HBM boundary on v5e/v6e where
    this op is purely HBM-bound); math runs in f32 in-kernel.
    donate=True aliases the input buffer into the output -- only use it when
    the caller no longer needs attention_scores (otherwise XLA inserts a copy).
    """
    B, H, S, L = attention_scores.shape
    assert L == pre_seq_len + S, "last dim must equal pre_seq_len + seq"
    M = B * H * S
    dtype = attention_scores.dtype
    itemsize = jnp.dtype(dtype).itemsize
    pack = max(8, 32 // itemsize)
    x2d = attention_scores.reshape(M, L)

    phys_vmem = _vmem_capacity_bytes()
    if tm is None:
        # Full (I/O + temporaries) footprint kept inside ~3/8 of physical
        # VMEM: 24 MiB on v7x (64 MiB/TC), 48 MiB on v5e/v6e (128 MiB).
        tm = _pick_tm(M, L, itemsize, phys_vmem * 3 // 8)
    assert tm == M or tm % pack == 0, (
        f"tm={tm} must be a multiple of {pack} for dtype {dtype}")

    # Lane-block-aligned width of the prefix slab.
    prefix_lanes = min(L, _lane_pad(pre_seq_len)) if pre_seq_len > 0 else 0

    footprint = tm * _bytes_per_row(L, itemsize)
    vmem_limit = int(min(phys_vmem * 3 // 4,
                         max(32 << 20, footprint + (8 << 20))))

    kernel = functools.partial(
        _prefix_selector_kernel,
        tau=float(tau),
        pre_seq_len=int(pre_seq_len),
        prefix_lanes=int(prefix_lanes),
    )

    cost = pl.CostEstimate(
        flops=6 * M * L,
        transcendentals=M * (L + 2 * prefix_lanes + 1),
        bytes_accessed=2 * M * L * itemsize,
    )

    # Note: a partial final tile (M % tm != 0) computes softmax over stale
    # VMEM rows; those writes are masked so results stay correct (wasted work
    # only).
    out2d = pl.pallas_call(
        kernel,
        out_shape=jax.ShapeDtypeStruct((M, L), dtype),
        grid_spec=pltpu.PrefetchScalarGridSpec(
            num_scalar_prefetch=0,
            grid=(pl.cdiv(M, tm),),
            in_specs=[pl.BlockSpec((tm, L), lambda i: (i, 0))],
            out_specs=pl.BlockSpec((tm, L), lambda i: (i, 0)),
        ),
        input_output_aliases=({0: 0} if donate else {}),
        compiler_params=pltpu.CompilerParams(
            dimension_semantics=("parallel",),
            vmem_limit_bytes=vmem_limit,
        ),
        cost_estimate=cost,
    )(x2d)

    return out2d.reshape(B, H, S, L)


def prefix_selector_ref(attention_scores, *, tau, pre_seq_len):
    """Pure-JAX reference mirroring the PyTorch forward (eval mode)."""
    B, H, S, L = attention_scores.shape
    prefix = attention_scores[..., :pre_seq_len] * tau
    mask = jax.nn.sigmoid(prefix)  # dropout == identity in eval
    ones = jnp.ones((B, H, S, S), dtype=attention_scores.dtype)
    log_term = jnp.log(jnp.concatenate([mask + 1e-30, ones], axis=-1))
    return jax.nn.softmax(attention_scores + log_term, axis=-1)


if __name__ == "__main__":
    # Config (deterministic, in-script): tau, pre_seq_len.
    tau = 2.0
    pre_seq_len = 8
    # TODO(synk): scores_dropout_prob dropout is a no-op in eval mode; training-mode
    # stochastic dropout is not implemented in the kernel.

    key = jax.random.PRNGKey(0)

    # --- Case 1: small module-like shapes (narrow rows, full-row branch) ---
    B, H, S = 2, 4, 16
    L = pre_seq_len + S  # 24
    x = jax.random.normal(key, (B, H, S, L), dtype=jnp.float32)

    ref = prefix_selector_ref(x, tau=tau, pre_seq_len=pre_seq_len)
    out = prefix_selector(x, tau=tau, pre_seq_len=pre_seq_len)
    out = jax.block_until_ready(out)
    assert out.shape == (B, H, S, L)
    assert jnp.allclose(out, ref, atol=1e-5, rtol=1e-5)

    # --- Case 2: wider rows, exercises the two-slab (no-concat) branch,
    #             plus donated input buffer ---
    B2, H2, S2 = 1, 2, 248
    L2 = pre_seq_len + S2  # 256 > 128 lanes
    x2 = jax.random.normal(jax.random.fold_in(key, 1), (B2, H2, S2, L2),
                           dtype=jnp.float32)
    ref2 = prefix_selector_ref(x2, tau=tau, pre_seq_len=pre_seq_len)
    out2 = jax.block_until_ready(
        prefix_selector(x2, tau=tau, pre_seq_len=pre_seq_len, donate=True))
    assert jnp.allclose(out2, ref2, atol=1e-5, rtol=1e-5)

    # --- Case 3: bf16 I/O at the HBM boundary (f32 math in-kernel) ---
    xb = x.astype(jnp.bfloat16)
    ref3 = prefix_selector_ref(xb.astype(jnp.float32),
                               tau=tau, pre_seq_len=pre_seq_len)
    out3 = jax.block_until_ready(
        prefix_selector(xb, tau=tau, pre_seq_len=pre_seq_len))
    assert out3.dtype == jnp.bfloat16
    assert jnp.allclose(out3.astype(jnp.float32), ref3, atol=2e-2, rtol=2e-2)

    print("KERNEL_OK")
</pallas_src>

<mosaic_0001>
module attributes {stable_mosaic.version = 11 : i64} {
  func.func @_prefix_selector_kernel(%arg0: i32, %arg1: memref<64x24xf32, #tpu.memory_space<vmem>>, %arg2: memref<64x24xf32, #tpu.memory_space<vmem>>) attributes {dimension_semantics = [#tpu.dimension_semantics<parallel>], iteration_bounds = array<i64: 2>, scalar_prefetch = 0 : i64, scratch_operands = 0 : i64, tpu.core_type = #tpu.core_type<tc>, window_params = [{transform_indices = @transform_0, window_bounds = array<i64: 64, 24>}, {transform_indices = @transform_1, window_bounds = array<i64: 64, 24>}]} {
    %c0 = arith.constant 0 : index
    %c0_0 = arith.constant 0 : index
    %0 = vector.load %arg1[%c0, %c0_0] : memref<64x24xf32, #tpu.memory_space<vmem>>, vector<64x24xf32>
    %cst = arith.constant 2.000000e+00 : f32
    %1 = vector.broadcast %cst : f32 to vector<64x24xf32>
    %2 = arith.mulf %0, %1 : vector<64x24xf32>
    %cst_1 = arith.constant 0.000000e+00 : f32
    %3 = vector.broadcast %cst_1 : f32 to vector<64x24xf32>
    %4 = arith.minimumf %2, %3 : vector<64x24xf32>
    %5 = math.absf %2 : vector<64x24xf32>
    %cst_2 = arith.constant 0.000000e+00 : f32
    %6 = vector.broadcast %cst_2 : f32 to vector<64x24xf32>
    %7 = arith.subf %6, %5 : vector<64x24xf32>
    %8 = math.exp %7 : vector<64x24xf32>
    %cst_3 = arith.constant 1.000000e+00 : f32
    %9 = vector.broadcast %cst_3 : f32 to vector<64x24xf32>
    %10 = arith.addf %9, %8 : vector<64x24xf32>
    %11 = math.log %10 : vector<64x24xf32>
    %12 = arith.subf %4, %11 : vector<64x24xf32>
    %cst_4 = arith.constant -69.0775528 : f32
    %13 = vector.broadcast %cst_4 : f32 to vector<64x24xf32>
    %14 = arith.maximumf %12, %13 : vector<64x24xf32>
    %15 = tpu.iota {dimensions = array<i32: 1>} : vector<64x24xi32>
    %c8_i32 = arith.constant 8 : i32
    %16 = vector.broadcast %c8_i32 : i32 to vector<64x24xi32>
    %17 = arith.cmpi slt, %15, %16 : vector<64x24xi32>
    %18 = arith.addf %0, %14 : vector<64x24xf32>
    %19 = arith.select %17, %18, %0 : vector<64x24xi1>, vector<64x24xf32>
    %cst_5 = arith.constant dense<0xFF800000> : vector<64xf32>
    %20 = vector.multi_reduction <maximumf>, %19, %cst_5 [1] : vector<64x24xf32> to vector<64xf32>
    %21 = vector.shape_cast %20 : vector<64xf32> to vector<64x1xf32>
    %22 = vector.broadcast %21 : vector<64x1xf32> to vector<64x24xf32>
    %23 = arith.subf %19, %22 : vector<64x24xf32>
    %24 = math.exp %23 : vector<64x24xf32>
    %cst_6 = arith.constant dense<0.000000e+00> : vector<64xf32>
    %25 = vector.multi_reduction <add>, %24, %cst_6 [1] : vector<64x24xf32> to vector<64xf32>
    %26 = vector.shape_cast %25 : vector<64xf32> to vector<64x1xf32>
    %27 = tpu.reciprocal %26 {approx = true} : vector<64x1xf32> -> vector<64x1xf32>
    %28 = arith.mulf %26, %27 : vector<64x1xf32>
    %cst_7 = arith.constant 2.000000e+00 : f32
    %29 = vector.broadcast %cst_7 : f32 to vector<64x1xf32>
    %30 = arith.subf %29, %28 : vector<64x1xf32>
    %31 = arith.mulf %27, %30 : vector<64x1xf32>
    %32 = vector.broadcast %31 : vector<64x1xf32> to vector<64x24xf32>
    %33 = arith.mulf %24, %32 : vector<64x24xf32>
    %c0_8 = arith.constant 0 : index
    %c0_9 = arith.constant 0 : index
    %34 = vector.load %arg2[%c0_8, %c0_9] : memref<64x24xf32, #tpu.memory_space<vmem>>, vector<64x24xf32>
    tpu.vector_store %arg2[%c0_8, %c0_9], %33 {strides = array<i32>} : memref<64x24xf32, #tpu.memory_space<vmem>>, vector<64x24xf32>,
    return
  }
  func.func @transform_0(%arg0: i32) -> (i32, i32) {
    %c0_i32 = arith.constant 0 : i32
    %c0_i32_0 = arith.constant 0 : i32
    return %arg0, %c0_i32 : i32, i32
  }
  func.func @transform_1(%arg0: i32) -> (i32, i32) {
    %c0_i32 = arith.constant 0 : i32
    %c0_i32_0 = arith.constant 0 : i32
    return %arg0, %c0_i32 : i32, i32
  }
}

</mosaic_0001>

<bundles_post_ra>
// kernel: tpu_custom_call.1
= control target key start
LH: loop header
LB: loop body
LE: loop exit
PB: predicated region body
PF: predicated region fallthrough
CT: control target
= control target key end

     0   :  { %s513_s6 = smov 0   ;;  %s678_s0 = inlined_call_operand.vmem [shape: f32[128,24], index: 0, kind: input, shape index: {}]   ;;  %s679_s1 = inlined_call_operand.vmem [shape: f32[128,24], index: 1, kind: output, shape index: {}]  }
   0x1 LB: > { %s412_s7 = sadd.s32 4294967295, %s501_s6   ;;  %p416_p0 = scmp.ge.s32.totalorder %s501_s6, 1  ;;  %s501_s6 = sphi %s513_s6, %s11_s6  }
   0x2   : > { %p88_p1 = scmp.lt.s32.totalorder %s501_s6, 3 }
   0x4   : > { %p89_p2 = pnand %p416_p0, %p88_p1 }
   0x5   : > { %s417_s8 = sshll.u32 (!%p89_p2), %s412_s7, 3 }
   0x6   : > { %92 = sbr.rel (%p89_p2) target bundleno = 336 (0x150), region = 24  ;;  %p109_p3 = scmp.lt.s32.totalorder (!%p89_p2), %s417_s8, 15 }
   0xb   : > { %s681_s8 = smov (!%p109_p3, %s417_s8), 15  ;;  %v216_v49 = vlaneseq  ;;  %vm235_vm1 = vcmask 195584  }
   0xc   : > { %s418_s9 = sshll.u32 %s681_s8, 3 }
   0xd   : > { %s112_s12 = scalar_lea.vmem %s678_s0, %s418_s9  ;;  %v578_v58 = vand.u32 127, %v216_v49  ;;  %s654_s15 = scalar_lea.vmem %s679_s1, %s418_s9 }
   0xe   : > { %v529_v0 = vld [vmem:[%s112_s12 + $0x20] sm:$0xff]  ;;  %v531_v1 = vld [vmem:[%s112_s12 + $0x10] sm:$0xff]  ;;  %v544_v6 = vld [vmem:[%s112_s12 + $0x28] sm:$0xff] }
   0xf   : > { %v533_v2 = vld [vmem:[%s112_s12] sm:$0xff]  ;;  %v536_v3 = vmul.f32 2.0, %v529_v0  ;;  %v539_v4 = vmul.f32 2.0, %v531_v1  ;;  %v546_v7 = vld [vmem:[%s112_s12 + $0x18] sm:$0xff]  ;;  %v549_v8 = vmul.f32 2.0, %v544_v6  ;;  %v556_v12 = vld [vmem:[%s112_s12 + $0x8] sm:$0xff] }
  0x10   : > { %v542_v5 = vmul.f32 2.0, %v533_v2  ;;  %v552_v9 = vmul.f32 2.0, %v546_v7  ;;  %v558_v13 = vld [vmem:[%s112_s12 + $0x30] sm:$0xff]  ;;  %v562_v16 = vld [vmem:[%s112_s12 + $0x38] sm:$0xff]  ;;  %v566_v22 = vmul.f32 2.0, %v556_v12  ;;  %vm218_vm0 = vcmp.lt.s32.totalorder %v578_v58, 8 }
  0x11   : > { %v148_v10 = vand.u32 2147483647, %v536_v3  ;;  %v146_v11 = vand.u32 2147483647, %v539_v4  ;;  %v149_v15 = vand.u32 2147483647, %v549_v8 }
  0x12   : > { %v144_v14 = vand.u32 2147483647, %v542_v5  ;;  %v147_v19 = vand.u32 2147483647, %v552_v9  ;;  %v569_v23 = vmul.f32 2.0, %v558_v13  ;;  %v572_v27 = vmul.f32 2.0, %v562_v16 }
  0x13   : > { %v156_v17 = vsub.f32 0.0, %v148_v10  ;;  %v154_v18 = vsub.f32 0.0, %v146_v11  ;;  %v157_v21 = vsub.f32 0.0, %v149_v15  ;;  %v145_v31 = vand.u32 2147483647, %v566_v22 }
  0x14   : > { %v152_v20 = vsub.f32 0.0, %v144_v14  ;;  %v155_v26 = vsub.f32 0.0, %v147_v19  ;;  %v150_v32 = vand.u32 2147483647, %v569_v23  ;;  %v151_v33 = vand.u32 2147483647, %v572_v27 }
  0x15   : > { %v168_v24 = vmul.f32 1.442695, %v156_v17  ;;  %v164_v25 = vmul.f32 1.442695, %v154_v18  ;;  %v170_v29 = vmul.f32 1.442695, %v157_v21 }
  0x16   : > { %v160_v28 = vmul.f32 1.442695, %v152_v20  ;;  %v166_v30 = vmul.f32 1.442695, %v155_v26  ;;  %v153_v34 = vsub.f32 0.0, %v145_v31  ;;  %v158_v35 = vsub.f32 0.0, %v150_v32 }
  0x17   : > { %431 = vpow2.f32 %v168_v24  ;;  %v159_v36 = vsub.f32 0.0, %v151_v33  ;;  %v140_v55 = vmin.f32 %v536_v3, 0.0  ;;  %v138_v59 = vmin.f32 %v539_v4, 0.0 }
  0x18   : > { %433 = vpow2.f32 %v164_v25  ;;  %v162_v37 = vmul.f32 1.442695, %v153_v34  ;;  %v172_v38 = vmul.f32 1.442695, %v158_v35  ;;  %v136_v63 = vmin.f32 %v542_v5, 0.0 }
  0x19   : > { %435 = vpow2.f32 %v160_v28  ;;  %v174_v39 = vmul.f32 1.442695, %v159_v36  ;;  %v141_v14 = vmin.f32 %v549_v8, 0.0  ;;  %v139_v18 = vmin.f32 %v552_v9, 0.0 }
  0x1a   : > { %437 = vpow2.f32 %v170_v29  ;;  %v137_v5 = vmin.f32 %v566_v22, 0.0  ;;  %v142_v29 = vmin.f32 %v569_v23, 0.0 }
  0x1b   : > { %439 = vpow2.f32 %v166_v30 }
  0x1c   : > { %441 = vpow2.f32 %v162_v37  ;;  %v143_v37 = vmin.f32 %v572_v27, 0.0 }
  0x1d   : > { %v432_v40 = vpop.eup %431  ;;  %443 = vpow2.f32 %v172_v38 }
  0x1e   : > { %v434_v41 = vpop.eup %433  ;;  %v180_v42 = vadd.f32 1.0, %v432_v40  ;;  %445 = vpow2.f32 %v174_v39 }
  0x1f   : > { %v436_v43 = vpop.eup %435  ;;  %v178_v44 = vadd.f32 1.0, %v434_v41 }
  0x20   : > { %v438_v45 = vpop.eup %437  ;;  %447 = vlog2.f32 %v180_v42  ;;  %v176_v46 = vadd.f32 1.0, %v436_v43 }
  0x21   : > { %v440_v47 = vpop.eup %439  ;;  %449 = vlog2.f32 %v178_v44  ;;  %v181_v48 = vadd.f32 1.0, %v438_v45 }
  0x22   : > { %451 = vlog2.f32 %v176_v46  ;;  %v179_v50 = vadd.f32 1.0, %v440_v47  ;;  %v442_v51 = vpop.eup %441 }
  0x23   : > { %453 = vlog2.f32 %v181_v48  ;;  %v444_v52 = vpop.eup %443  ;;  %v177_v53 = vadd.f32 1.0, %v442_v51 }
  0x24   : > { %455 = vlog2.f32 %v179_v50  ;;  %v446_v54 = vpop.eup %445  ;;  %v182_v56 = vadd.f32 1.0, %v444_v52 }
  0x25   : > { %457 = vlog2.f32 %v177_v53  ;;  %v183_v60 = vadd.f32 1.0, %v446_v54 }
  0x26   : > { %v448_v57 = vpop.eup %447  ;;  %459 = vlog2.f32 %v182_v56 }
  0x27   : > { %v450_v61 = vpop.eup %449  ;;  %v193_v62 = vmul.f32 0.6931472, %v448_v57  ;;  %461 = vlog2.f32 %v183_v60 }
  0x28   : > { %v452_v10 = vpop.eup %451  ;;  %v189_v11 = vmul.f32 0.6931472, %v450_v61 }
  0x29   : > { %v454_v15 = vpop.eup %453  ;;  %v204_v17 = vsub.f32 %v140_v55, %v193_v62  ;;  %v185_v3 = vmul.f32 0.6931472, %v452_v10 }
  0x2a   : > { %v456_v19 = vpop.eup %455  ;;  %v202_v4 = vsub.f32 %v138_v59, %v189_v11  ;;  %v195_v20 = vmul.f32 0.6931472, %v454_v15 }
  0x2b   : > { %v212_v21 = vmax.f32 %v204_v17, -69.07755  ;;  %v200_v24 = vsub.f32 %v136_v63, %v185_v3  ;;  %v191_v25 = vmul.f32 0.6931472, %v456_v19  ;;  %v458_v26 = vpop.eup %457 }
  0x2c   : > { %v210_v28 = vmax.f32 %v202_v4, -69.07755  ;;  %v205_v8 = vsub.f32 %v141_v14, %v195_v20  ;;  %v460_v30 = vpop.eup %459  ;;  %v187_v33 = vmul.f32 0.6931472, %v458_v26 }
  0x2d   : > { %v223_v9 = vadd.f32 %v212_v21, %v529_v0  ;;  %v208_v31 = vmax.f32 %v200_v24, -69.07755  ;;  %v203_v32 = vsub.f32 %v139_v18, %v191_v25  ;;  %v197_v36 = vmul.f32 0.6931472, %v460_v30  ;;  %v462_v38 = vpop.eup %461 }
  0x2e   : > { %v221_v34 = vadd.f32 %v210_v28, %v531_v1  ;;  %v213_v35 = vmax.f32 %v205_v8, -69.07755  ;;  %v201_v40 = vsub.f32 %v137_v5, %v187_v33  ;;  %v199_v48 = vmul.f32 0.6931472, %v462_v38 }
  0x2f   : > { %v593_v22 = vsel %vm218_vm0, %v223_v9, %v529_v0  ;;  %v219_v23 = vadd.f32 %v208_v31, %v533_v2  ;;  %v211_v39 = vmax.f32 %v203_v32, -69.07755  ;;  %v206_v27 = vsub.f32 %v142_v29, %v197_v36 }
  0x30   : > { %v248_v41 = vsel %vm235_vm1, %v593_v22, -inf  ;;  %v229_v42 = vsel %vm218_vm0, %v221_v34, %v531_v1  ;;  %v224_v43 = vadd.f32 %v213_v35, %v544_v6  ;;  %v209_v46 = vmax.f32 %v201_v40, -69.07755 }
  0x31   : > { %249 = vmax.xlane.f32.xlu2 %v248_v41  ;;  %v242_v44 = vsel %vm235_vm1, %v229_v42, -inf  ;;  %v227_v0 = vsel %vm218_vm0, %v219_v23, %v533_v2  ;;  %v222_v45 = vadd.f32 %v211_v39, %v546_v7  ;;  %v207_v51 = vsub.f32 %v143_v37, %v199_v48 }
  0x32   : > { %243 = vmax.xlane.f32.xlu1 %v242_v44  ;;  %v236_v47 = vsel %vm235_vm1, %v227_v0, -inf  ;;  %v232_v1 = vsel %vm218_vm0, %v224_v43, %v544_v6  ;;  %v220_v49 = vadd.f32 %v209_v46, %v556_v12  ;;  %v214_v52 = vmax.f32 %v206_v27, -69.07755 }
  0x33   : > { %237 = vmax.xlane.f32.xlu0 %v236_v47  ;;  %v230_v50 = vsel %vm218_vm0, %v222_v45, %v546_v7  ;;  %v251_v53 = vsel %vm235_vm1, %v232_v1, -inf  ;;  %v215_v54 = vmax.f32 %v207_v51, -69.07755 }
  0x34   : > { %v228_v2 = vsel %vm218_vm0, %v220_v49, %v556_v12  ;;  %v245_v55 = vsel %vm235_vm1, %v230_v50, -inf  ;;  %v225_v57 = vadd.f32 %v214_v52, %v558_v13 }
  0x35   : > { %v239_v56 = vsel %vm235_vm1, %v228_v2, -inf  ;;  %v226_v6 = vadd.f32 %v215_v54, %v562_v16 }
  0x36   : > { %v233_v12 = vsel %vm218_vm0, %v225_v57, %v558_v13 }
  0x37   : > { %v234_v7 = vsel %vm218_vm0, %v226_v6, %v562_v16  ;;  %v254_v60 = vsel %vm235_vm1, %v233_v12, -inf }
  0x38   : > { %v257_v59 = vsel %vm235_vm1, %v234_v7, -inf }
  0x39   : > { %252 = vmax.xlane.f32.xlu2 %v251_v53 }
  0x3a   : > { %246 = vmax.xlane.f32.xlu1 %v245_v55 }
  0x3b   : > { %240 = vmax.xlane.f32.xlu0 %v239_v56 }
  0x42   : > { %258 = vmax.xlane.f32.xlu1 %v257_v59 }
  0x43   : > { %255 = vmax.xlane.f32.xlu0 %v254_v60 }
  0xa4   : > { %v250_v61 = vpop.xlane.xlu2 %249 }
  0xa5   : > { %v244_v62 = vpop.xlane.xlu1 %243  ;;  %v264_v18 = vsub.f32 %v593_v22, %v250_v61 }
  0xa6   : > { %v262_v63 = vsub.f32 %v229_v42, %v244_v62  ;;  %v238_v10 = vpop.xlane.xlu0 %237 }
  0xa7   : > { %v260_v11 = vsub.f32 %v227_v0, %v238_v10  ;;  %v276_v28 = vmul.f32 1.442695, %v264_v18 }
  0xa8   : > { %v272_v14 = vmul.f32 1.442695, %v262_v63 }
  0xa9   : > { %v268_v15 = vmul.f32 1.442695, %v260_v11 }
  0xaa   : > { %463 = vpow2.f32 %v272_v14 }
  0xab   : > { %465 = vpow2.f32 %v268_v15 }
  0xac   : > { %v253_v16 = vpop.xlane.xlu2 %252 }
  0xad   : > { %v265_v17 = vsub.f32 %v232_v1, %v253_v16  ;;  %v247_v3 = vpop.xlane.xlu1 %246 }
  0xae   : > { %v263_v58 = vsub.f32 %v230_v50, %v247_v3  ;;  %v241_v13 = vpop.xlane.xlu0 %240 }
  0xaf   : > { %v278_v19 = vmul.f32 1.442695, %v265_v17  ;;  %v261_v4 = vsub.f32 %v228_v2, %v241_v13 }
  0xb0   : > { %v464_v20 = vpop.eup %463  ;;  %v274_v21 = vmul.f32 1.442695, %v263_v58 }
  0xb1   : > { %v466_v24 = vpop.eup %465  ;;  %467 = vpow2.f32 %v278_v19  ;;  %v270_v25 = vmul.f32 1.442695, %v261_v4  ;;  %v290_v5 = vsel %vm235_vm1, %v464_v20, 0.0 }
  0xb2   : > { %469 = vpow2.f32 %v274_v21  ;;  %291 = vadd.xlane.f32.xlu1 %v290_v5  ;;  %v284_v26 = vsel %vm235_vm1, %v466_v24, 0.0 }
  0xb3   : > { %471 = vpow2.f32 %v270_v25  ;;  %285 = vadd.xlane.f32.xlu2 %v284_v26 }
  0xb4   : > { %473 = vpow2.f32 %v276_v28 }
  0xb5   : > { %v259_v8 = vpop.xlane.xlu1 %258 }
  0xb6   : > { %v256_v29 = vpop.xlane.xlu0 %255  ;;  %v267_v31 = vsub.f32 %v234_v7, %v259_v8 }
  0xb7   : > { %v634_v30 = vpop.eup %467  ;;  %v266_v9 = vsub.f32 %v233_v12, %v256_v29 }
  0xb8   : > { %v470_v32 = vpop.eup %469  ;;  %v299_v33 = vsel %vm235_vm1, %v634_v30, 0.0  ;;  %v282_v38 = vmul.f32 1.442695, %v267_v31 }
  0xb9   : > { %v472_v34 = vpop.eup %471  ;;  %v280_v35 = vmul.f32 1.442695, %v266_v9  ;;  %v293_v36 = vsel %vm235_vm1, %v470_v32, 0.0 }
  0xba   : > { %300 = vadd.xlane.f32.xlu1 %v299_v33  ;;  %v287_v37 = vsel %vm235_vm1, %v472_v34, 0.0  ;;  %v640_v22 = vpop.eup %473 }
  0xbb   : > { %475 = vpow2.f32 %v280_v35  ;;  %294 = vadd.xlane.f32.xlu2 %v293_v36  ;;  %288 = vadd.xlane.f32.xlu0 %v287_v37  ;;  %v296_v23 = vsel %vm235_vm1, %v640_v22, 0.0 }
  0xbc   : > { %477 = vpow2.f32 %v282_v38 }
  0xc1   : > { %v476_v39 = vpop.eup %475 }
  0xc2   : > { %v302_v40 = vsel %vm235_vm1, %v476_v39, 0.0  ;;  %v645_v41 = vpop.eup %477 }
  0xc3   : > { %297 = vadd.xlane.f32.xlu0 %v296_v23  ;;  %303 = vadd.xlane.f32.xlu2 %v302_v40  ;;  %v305_v42 = vsel %vm235_vm1, %v645_v41, 0.0 }
  0xcb   : > { %306 = vadd.xlane.f32.xlu0 %v305_v42 }
 0x125   : > { %v292_v43 = vpop.xlane.xlu1 %291 }
 0x126   : > { %479 = vrcp.f32 %v292_v43  ;;  %v286_v27 = vpop.xlane.xlu2 %285 }
 0x127   : > { %481 = vrcp.f32 %v286_v27 }
 0x12c   : > { %v480_v44 = vpop.eup %479 }
 0x12d   : > { %v482_v0 = vpop.eup %481  ;;  %v318_v45 = vmul.f32 %v480_v44, %v292_v43  ;;  %v301_v46 = vpop.xlane.xlu1 %300 }
 0x12e   : > { %v316_v47 = vmul.f32 %v482_v0, %v286_v27  ;;  %483 = vrcp.f32 %v301_v46  ;;  %v295_v48 = vpop.xlane.xlu2 %294  ;;  %v289_v1 = vpop.xlane.xlu0 %288 }
 0x12f   : > { %v326_v49 = vsub.f32 2.0, %v318_v45  ;;  %485 = vrcp.f32 %v295_v48 }
 0x130   : > { %v324_v50 = vsub.f32 2.0, %v316_v47  ;;  %487 = vrcp.f32 %v289_v1 }
 0x131   : > { %v334_v51 = vmul.f32 %v480_v44, %v326_v49 }
 0x132   : > { %v332_v2 = vmul.f32 %v482_v0, %v324_v50 }
 0x133   : > { %v342_v52 = vmul.f32 %v464_v20, %v334_v51 }
 0x134   : > { %v484_v53 = vpop.eup %483  ;;  %v340_v54 = vmul.f32 %v466_v24, %v332_v2 }
 0x135   : > { %v486_v55 = vpop.eup %485  ;;  %350 = vst.msk [vmem:[%s654_s15 + $0x10] sm:$0xff] %vm235_vm1, %v342_v52  ;;  %v321_v56 = vmul.f32 %v484_v53, %v301_v46 }
 0x136   : > { %v488_v6 = vpop.eup %487  ;;  %348 = vst.msk [vmem:[%s654_s15] sm:$0xff] %vm235_vm1, %v340_v54  ;;  %v319_v57 = vmul.f32 %v486_v55, %v295_v48  ;;  %v304_v7 = vpop.xlane.xlu2 %303 }
 0x137   : > { %v298_v12 = vpop.xlane.xlu0 %297  ;;  %v329_v59 = vsub.f32 2.0, %v321_v56  ;;  %v317_v60 = vmul.f32 %v488_v6, %v289_v1  ;;  %489 = vrcp.f32 %v304_v7 }
 0x138   : > { %v327_v61 = vsub.f32 2.0, %v319_v57  ;;  %491 = vrcp.f32 %v298_v12 }
 0x139   : > { %v337_v62 = vmul.f32 %v484_v53, %v329_v59  ;;  %v325_v63 = vsub.f32 2.0, %v317_v60 }
 0x13a   : > { %v335_v10 = vmul.f32 %v486_v55, %v327_v61 }
 0x13b   : > { %v345_v11 = vmul.f32 %v634_v30, %v337_v62  ;;  %v333_v14 = vmul.f32 %v488_v6, %v325_v63 }
 0x13c   : > { %v343_v15 = vmul.f32 %v470_v32, %v335_v10 }
 0x13d   : > { %v490_v16 = vpop.eup %489  ;;  %353 = vst.msk [vmem:[%s654_s15 + $0x28] sm:$0xff] %vm235_vm1, %v345_v11  ;;  %v341_v17 = vmul.f32 %v472_v34, %v333_v14 }
 0x13e   : > { %v492_v3 = vpop.eup %491  ;;  %351 = vst.msk [vmem:[%s654_s15 + $0x18] sm:$0xff] %vm235_vm1, %v343_v15  ;;  %v322_v58 = vmul.f32 %v490_v16, %v304_v7 }
 0x13f   : > { %v307_v13 = vpop.xlane.xlu0 %306  ;;  %349 = vst.msk [vmem:[%s654_s15 + $0x8] sm:$0xff] %vm235_vm1, %v341_v17  ;;  %v320_v18 = vmul.f32 %v492_v3, %v298_v12 }
 0x140   : > { %493 = vrcp.f32 %v307_v13  ;;  %v330_v19 = vsub.f32 2.0, %v322_v58 }
 0x141   : > { %v328_v4 = vsub.f32 2.0, %v320_v18 }
 0x142   : > { %v338_v20 = vmul.f32 %v490_v16, %v330_v19 }
 0x143   : > { %v336_v21 = vmul.f32 %v492_v3, %v328_v4 }
 0x144   : > { %v346_v24 = vmul.f32 %v476_v39, %v338_v20 }
 0x145   : > { %v344_v5 = vmul.f32 %v640_v22, %v336_v21 }
 0x146   : > { %v494_v25 = vpop.eup %493  ;;  %354 = vst.msk [vmem:[%s654_s15 + $0x30] sm:$0xff] %vm235_vm1, %v346_v24 }
 0x147   : > { %v323_v26 = vmul.f32 %v494_v25, %v307_v13  ;;  %352 = vst.msk [vmem:[%s654_s15 + $0x20] sm:$0xff] %vm235_vm1, %v344_v5 }
 0x149   : > { %v331_v28 = vsub.f32 2.0, %v323_v26 }
 0x14b   : > { %v339_v8 = vmul.f32 %v494_v25, %v331_v28 }
 0x14d   : > { %v347_v29 = vmul.f32 %v645_v41, %v339_v8 }
 0x14f   : > { %355 = vst.msk [vmem:[%s654_s15 + $0x38] sm:$0xff] %vm235_vm1, %v347_v29 }
 0x150 PF: > { %s11_s6 = sadd.s32 1, %s501_s6  }
 0x151   : > { %p8_p4 = scmp.ge.s32.totalorder %s11_s6, 4  }
 0x153   :  { %10 = sbr.rel (!%p8_p4) target bundleno = 1 (0x1), region = 54 }

</bundles_post_ra>
